<compile_context>
chip_gen: v5e
topology: v5e:2x2
jax: 0.10.0
libtpu: 0.0.40
codegen_flags: <defaults>
</compile_context>

<pallas_src>
import numpy as np
import jax
import jax.numpy as jnp
from jax.experimental import pallas as pl
from jax.experimental.pallas import tpu as pltpu


# ---------------------------------------------------------------------------
# Wavelet filters (deterministic, in-script; no pywt / checkpoint loading).
# pywt.Wavelet('haar'): dec_lo = [1/sqrt(2), 1/sqrt(2)], dec_hi = [-1/sqrt(2), 1/sqrt(2)]
# ---------------------------------------------------------------------------
_WAVELETS = {
    "haar": (
        [0.7071067811865476, 0.7071067811865476],     # dec_lo
        [-0.7071067811865476, 0.7071067811865476],    # dec_hi
    ),
}


def _build_idwt_matrices(depth, height, width, wavename="haar"):
    """Replicates IDWT_3D.__init__ + get_matrix with numpy (float64)."""
    dec_lo, dec_hi = _WAVELETS[wavename]
    band_low = list(reversed(dec_lo))
    band_high = list(reversed(dec_hi))
    assert len(band_low) == len(band_high)
    band_length = len(band_low)
    assert band_length % 2 == 0
    band_length_half = band_length // 2

    L1 = max(height, width)
    L = L1 // 2
    matrix_h = np.zeros((L, L1 + band_length - 2), dtype=np.float64)
    matrix_g = np.zeros((L1 - L, L1 + band_length - 2), dtype=np.float64)
    end = None if band_length_half == 1 else -band_length_half + 1

    index = 0
    for i in range(L):
        for j in range(band_length):
            matrix_h[i, index + j] = band_low[j]
        index += 2
    matrix_h_0 = matrix_h[0:height // 2, 0:height + band_length - 2]
    matrix_h_1 = matrix_h[0:width // 2, 0:width + band_length - 2]
    matrix_h_2 = matrix_h[0:depth // 2, 0:depth + band_length - 2]

    index = 0
    for i in range(L1 - L):
        for j in range(band_length):
            matrix_g[i, index + j] = band_high[j]
        index += 2
    matrix_g_0 = matrix_g[0:height - height // 2, 0:height + band_length - 2]
    matrix_g_1 = matrix_g[0:width - width // 2, 0:width + band_length - 2]
    matrix_g_2 = matrix_g[0:depth - depth // 2, 0:depth + band_length - 2]

    matrix_h_0 = matrix_h_0[:, band_length_half - 1:end]                  # (Hh, H)
    matrix_h_1 = np.transpose(matrix_h_1[:, band_length_half - 1:end])    # (W, Wh)
    matrix_h_2 = matrix_h_2[:, band_length_half - 1:end]                  # (Dh, D)
    matrix_g_0 = matrix_g_0[:, band_length_half - 1:end]                  # (Hg, H)
    matrix_g_1 = np.transpose(matrix_g_1[:, band_length_half - 1:end])    # (W, Wg)
    matrix_g_2 = matrix_g_2[:, band_length_half - 1:end]                  # (Dg, D)

    return matrix_h_0, matrix_h_1, matrix_h_2, matrix_g_0, matrix_g_1, matrix_g_2


# ---------------------------------------------------------------------------
# Fused kernel: per grid step, CB channel slices are fully reconstructed.
#   x_ref  : (CB*D, H*W)  per-slice rows = [lo-depth rows (Dh) ; hi-depth rows (Dg)],
#            columns     = [LL | LH | HL | HH] flattened bands (lane-dense, = H*W)
#   k2_ref : (D, D)       = [m2L^T | m2H^T]        (depth recombination)
#   ms_ref : (H*W, H*W)   = vstack of kron(m0,m1^T) (width+height recombination)
# ---------------------------------------------------------------------------
def _idwt3d_fused_kernel(x_ref, k2_ref, ms_ref, out_ref, a2_ref):
    f32 = jnp.float32
    k2 = k2_ref[...]                          # (D, D)
    d = k2.shape[0]
    n_slices = x_ref.shape[0] // d

    # Stage 1 (depth): block-diagonal over slices -> per-slice dot, zero wasted MACs.
    # Statically unrolled; each dot is (D, D) @ (D, H*W) written into the scratch.
    for s in range(n_slices):
        r0 = s * d
        a2_ref[r0:r0 + d, :] = jnp.dot(
            k2, x_ref[r0:r0 + d, :], preferred_element_type=f32)

    # Stage 2+3 (width + height, folded): ONE MXU dot, M = CB*D, K = N = H*W.
    out_ref[...] = jnp.dot(
        a2_ref[...], ms_ref[...], preferred_element_type=f32).astype(out_ref.dtype)


def _vmem_capacity_bytes():
    """Physical VMEM of the attached TPU; conservative fallback if unqueryable."""
    try:
        info = pltpu.get_tpu_info()
        for attr in ("vmem_capacity_bytes", "vmem_size_bytes", "vmem_bytes"):
            v = getattr(info, attr, None)
            if v:
                return int(v)
    except Exception:
        pass
    return 64 * 2 ** 20        # v7x physical VMEM (smallest of v5e/v6e/v7x)


def _pick_channels_per_block(B, D, hw):
    """Channel slices per grid step + an explicit scoped-VMEM limit.

    Sized from actual hardware VMEM (~55% for the working set), counting the
    double-buffered input/output blocks, the (CB*D, H*W) f32 scratch, one dot
    temporary and the double-buffered filter constants.  Prefers >= 4 grid steps
    (keeps both v7x TensorCores busy under dimension_semantics=("parallel",)) and
    grows CB until the stage-2/3 LHS has >= 256 rows (MXU fill on v6e/v7x).
    """
    cap = _vmem_capacity_bytes()
    budget = int(0.55 * cap)

    blk = lambda cb: cb * D * hw * 4
    consts = 2 * 4 * (D * D + hw * hw)            # filter constants, double-buffered

    def legal(cb):
        # block sublane dim must be a multiple of 8 unless it spans the whole array
        return B % cb == 0 and (cb == B or (cb * D) % 8 == 0)

    def vmem_est(cb):
        # 2x input + 2x output (double-buffered) + scratch + dot temporary
        return 6 * blk(cb) + consts

    cand = [cb for cb in range(1, B + 1) if legal(cb)]      # never empty (cb == B legal)
    fits = [cb for cb in cand if vmem_est(cb) <= budget] or cand[:1]

    choice = max(fits)
    for min_steps in (4, 2, 1):
        good = [cb for cb in fits if B // cb >= min_steps]
        if good:
            big = [cb for cb in good if cb * D >= 256]
            choice = min(big) if big else max(good)
            break

    vmem_limit = int(min(max(int(0.7 * cap), 32 * 2 ** 20), 100 * 2 ** 20))
    return choice, vmem_limit


# ---------------------------------------------------------------------------
# IDWT_3D forward (matches IDWTFunction_3D.forward semantics)
# ---------------------------------------------------------------------------
def idwt_3d(LLL, LLH, LHL, LHH, HLL, HLH, HHL, HHH, wavename="haar"):
    N, C, Dh, Hh, Wh = LLL.shape
    Dg, Hg, Wg = HHH.shape[2], HHH.shape[3], HHH.shape[4]
    D, H, W = Dh + Dg, Hh + Hg, Wh + Wg
    B = N * C
    hw = H * W     # Hh*Wh + Hh*Wg + Hg*Wh + Hg*Wg == H*W

    m0L, m1L, m2L, m0H, m1H, m2H = _build_idwt_matrices(D, H, W, wavename)
    # m0L (Hh,H), m1L (W,Wh), m2L (Dh,D); m0H (Hg,H), m1H (W,Wg), m2H (Dg,D)

    # Depth recombination for a lo/hi-stacked slice: one (D, D) matrix.
    K2 = np.concatenate([m2L.T, m2H.T], axis=1)                 # (D, Dh+Dg) = (D, D)
    # Width + height recombination for the band-concatenated columns: one (H*W, H*W)
    # matrix (row-block order must match the [LL | LH | HL | HH] column order below).
    MSTACK = np.concatenate([np.kron(m0L, m1L.T),               # (Hh*Wh, H*W)
                             np.kron(m0L, m1H.T),               # (Hh*Wg, H*W)
                             np.kron(m0H, m1L.T),               # (Hg*Wh, H*W)
                             np.kron(m0H, m1H.T)], axis=0)      # -> (H*W, H*W)

    f32 = jnp.float32

    # 8 subbands -> ONE lane-dense (B*D, H*W) input array (cheap contiguous concats).
    def flat(x):
        n, c, dk, hk, wk = x.shape
        return x.astype(f32).reshape(n * c, dk, hk * wk)

    lo = jnp.concatenate([flat(LLL), flat(LLH), flat(LHL), flat(LHH)], axis=-1)  # (B, Dh, H*W)
    hi = jnp.concatenate([flat(HLL), flat(HLH), flat(HHL), flat(HHH)], axis=-1)  # (B, Dg, H*W)
    x2 = jnp.concatenate([lo, hi], axis=1).reshape(B * D, hw)                    # (B*D, H*W)

    CB, vmem_limit = _pick_channels_per_block(B, D, hw)
    grid = (B // CB,)

    cost = pl.CostEstimate(
        flops=int(2 * B * D * hw * hw + 2 * B * D * D * hw),
        transcendentals=0,
        bytes_accessed=int(4 * (2 * B * D * hw + D * D + hw * hw)),
    )

    out2 = pl.pallas_call(
        _idwt3d_fused_kernel,
        out_shape=jax.ShapeDtypeStruct((B * D, hw), f32),
        grid_spec=pltpu.PrefetchScalarGridSpec(
            num_scalar_prefetch=0,
            grid=grid,
            in_specs=[
                pl.BlockSpec((CB * D, hw), lambda i: (i, 0)),   # stacked subbands block
                pl.BlockSpec((D, D), lambda i: (0, 0)),         # [m2L^T | m2H^T], fixed
                pl.BlockSpec((hw, hw), lambda i: (0, 0)),       # stacked kron, fixed
            ],
            out_specs=pl.BlockSpec((CB * D, hw), lambda i: (i, 0)),
            scratch_shapes=[pltpu.VMEM((CB * D, hw), f32)],     # depth-stage result
        ),
        compiler_params=pltpu.CompilerParams(
            dimension_semantics=("parallel",),
            vmem_limit_bytes=vmem_limit,
        ),
        cost_estimate=cost,
    )(x2, jnp.asarray(K2, f32), jnp.asarray(MSTACK, f32))

    return out2.reshape(N, C, D, H, W)


# ---------------------------------------------------------------------------
# Pure-JAX reference with the exact torch matmul/transpose structure.
# ---------------------------------------------------------------------------
def idwt_3d_ref(LLL, LLH, LHL, LHH, HLL, HLH, HHL, HHH, wavename="haar"):
    N, C, Dh, Hh, Wh = LLL.shape
    D = Dh + HHH.shape[2]
    H = Hh + HHH.shape[3]
    W = Wh + HHH.shape[4]
    mats = _build_idwt_matrices(D, H, W, wavename)
    m0L, m1L, m2L, m0H, m1H, m2H = [jnp.asarray(m, jnp.float32) for m in mats]

    prec = jax.lax.Precision.HIGHEST
    mm = lambda a, b: jnp.matmul(a, b, precision=prec)
    t = lambda x: jnp.swapaxes(x, 2, 3)

    LL = t(mm(m2L.T, t(LLL)) + mm(m2H.T, t(HLL)))
    LH = t(mm(m2L.T, t(LLH)) + mm(m2H.T, t(HLH)))
    HL = t(mm(m2L.T, t(LHL)) + mm(m2H.T, t(HHL)))
    HH = t(mm(m2L.T, t(LHH)) + mm(m2H.T, t(HHH)))
    L_ = mm(LL, m1L.T) + mm(LH, m1H.T)
    H_ = mm(HL, m1L.T) + mm(HH, m1H.T)
    return mm(m0L.T, L_) + mm(m0H.T, H_)


if __name__ == "__main__":
    # Small shapes: N=2, C=4, D=8, H=16, W=16 -> subbands (2, 4, 4, 8, 8)
    N, C, D, H, W = 2, 4, 8, 16, 16
    sub_shape = (N, C, D // 2, H // 2, W // 2)

    key = jax.random.PRNGKey(0)
    keys = jax.random.split(key, 8)
    subbands = [jax.random.normal(k, sub_shape, dtype=jnp.float32) for k in keys]

    out = jax.block_until_ready(jax.jit(idwt_3d)(*subbands))
    ref = jax.block_until_ready(idwt_3d_ref(*subbands))

    assert out.shape == (N, C, D, H, W), out.shape
    assert out.dtype == jnp.float32
    np.testing.assert_allclose(np.asarray(out), np.asarray(ref), rtol=1e-5, atol=1e-5)

    print("KERNEL_OK")
</pallas_src>

<mosaic_0001>
module attributes {stable_mosaic.version = 11 : i64} {
  func.func @_idwt3d_fused_kernel(%arg0: i32, %arg1: memref<16x256xf32, #tpu.memory_space<vmem>>, %arg2: memref<8x8xf32, #tpu.memory_space<vmem>>, %arg3: memref<256x256xf32, #tpu.memory_space<vmem>>, %arg4: memref<16x256xf32, #tpu.memory_space<vmem>>, %arg5: memref<16x256xf32, #tpu.memory_space<vmem>>) attributes {dimension_semantics = [#tpu.dimension_semantics<parallel>], iteration_bounds = array<i64: 4>, scalar_prefetch = 0 : i64, scratch_operands = 1 : i64, tpu.core_type = #tpu.core_type<tc>, window_params = [{transform_indices = @transform_0, window_bounds = array<i64: 16, 256>}, {pipeline_mode = #tpu.pipeline_mode<synchronous>, transform_indices = @transform_1, window_bounds = array<i64: 8, 8>}, {pipeline_mode = #tpu.pipeline_mode<synchronous>, transform_indices = @transform_2, window_bounds = array<i64: 256, 256>}, {transform_indices = @transform_3, window_bounds = array<i64: 16, 256>}]} {
    %c0 = arith.constant 0 : index
    %c0_0 = arith.constant 0 : index
    %0 = vector.load %arg2[%c0, %c0_0] : memref<8x8xf32, #tpu.memory_space<vmem>>, vector<8x8xf32>
    %c0_1 = arith.constant 0 : index
    %c0_2 = arith.constant 0 : index
    %1 = vector.load %arg1[%c0_1, %c0_2] : memref<16x256xf32, #tpu.memory_space<vmem>>, vector<8x256xf32>
    %cst = arith.constant dense<0.000000e+00> : vector<8x256xf32>
    %2 = tpu.matmul %0, %1, %cst {dimension_numbers = #tpu.dot_dimension_numbers<[1], [0], [0], [1], [0, 0, 1, 1], [], []>} : vector<8x8xf32>, vector<8x256xf32>, vector<8x256xf32> -> vector<8x256xf32>
    %c0_3 = arith.constant 0 : index
    %c0_4 = arith.constant 0 : index
    %3 = vector.load %arg5[%c0_3, %c0_4] : memref<16x256xf32, #tpu.memory_space<vmem>>, vector<8x256xf32>
    tpu.vector_store %arg5[%c0_3, %c0_4], %2 {strides = array<i32>} : memref<16x256xf32, #tpu.memory_space<vmem>>, vector<8x256xf32>,
    %c8 = arith.constant 8 : index
    %c0_5 = arith.constant 0 : index
    %4 = vector.load %arg1[%c8, %c0_5] : memref<16x256xf32, #tpu.memory_space<vmem>>, vector<8x256xf32>
    %cst_6 = arith.constant dense<0.000000e+00> : vector<8x256xf32>
    %5 = tpu.matmul %0, %4, %cst_6 {dimension_numbers = #tpu.dot_dimension_numbers<[1], [0], [0], [1], [0, 0, 1, 1], [], []>} : vector<8x8xf32>, vector<8x256xf32>, vector<8x256xf32> -> vector<8x256xf32>
    %c8_7 = arith.constant 8 : index
    %c0_8 = arith.constant 0 : index
    %6 = vector.load %arg5[%c8_7, %c0_8] : memref<16x256xf32, #tpu.memory_space<vmem>>, vector<8x256xf32>
    tpu.vector_store %arg5[%c8_7, %c0_8], %5 {strides = array<i32>} : memref<16x256xf32, #tpu.memory_space<vmem>>, vector<8x256xf32>,
    %c0_9 = arith.constant 0 : index
    %c0_10 = arith.constant 0 : index
    %7 = vector.load %arg5[%c0_9, %c0_10] : memref<16x256xf32, #tpu.memory_space<vmem>>, vector<16x256xf32>
    %c0_11 = arith.constant 0 : index
    %c0_12 = arith.constant 0 : index
    %8 = vector.load %arg3[%c0_11, %c0_12] : memref<256x256xf32, #tpu.memory_space<vmem>>, vector<256x256xf32>
    %cst_13 = arith.constant dense<0.000000e+00> : vector<16x256xf32>
    %9 = tpu.matmul %7, %8, %cst_13 {dimension_numbers = #tpu.dot_dimension_numbers<[1], [0], [0], [1], [0, 0, 1, 1], [], []>} : vector<16x256xf32>, vector<256x256xf32>, vector<16x256xf32> -> vector<16x256xf32>
    %c0_14 = arith.constant 0 : index
    %c0_15 = arith.constant 0 : index
    %10 = vector.load %arg4[%c0_14, %c0_15] : memref<16x256xf32, #tpu.memory_space<vmem>>, vector<16x256xf32>
    tpu.vector_store %arg4[%c0_14, %c0_15], %9 {strides = array<i32>} : memref<16x256xf32, #tpu.memory_space<vmem>>, vector<16x256xf32>,
    return
  }
  func.func @transform_0(%arg0: i32) -> (i32, i32) {
    %c0_i32 = arith.constant 0 : i32
    %c0_i32_0 = arith.constant 0 : i32
    return %arg0, %c0_i32 : i32, i32
  }
  func.func @transform_1(%arg0: i32) -> (i32, i32) {
    %c0_i32 = arith.constant 0 : i32
    %c0_i32_0 = arith.constant 0 : i32
    %c0_i32_1 = arith.constant 0 : i32
    return %c0_i32, %c0_i32_0 : i32, i32
  }
  func.func @transform_2(%arg0: i32) -> (i32, i32) {
    %c0_i32 = arith.constant 0 : i32
    %c0_i32_0 = arith.constant 0 : i32
    %c0_i32_1 = arith.constant 0 : i32
    return %c0_i32, %c0_i32_0 : i32, i32
  }
  func.func @transform_3(%arg0: i32) -> (i32, i32) {
    %c0_i32 = arith.constant 0 : i32
    %c0_i32_0 = arith.constant 0 : i32
    return %arg0, %c0_i32 : i32, i32
  }
}

</mosaic_0001>

<bundles_post_ra>
// kernel: idwt_3d.1
= control target key start
LH: loop header
LB: loop body
LE: loop exit
PB: predicated region body
PF: predicated region fallthrough
CT: control target
= control target key end

     0   :  { %s549_s12 = smov 0   ;;  %s772_s0 = inlined_call_operand.vmem [shape: f32[64,256], index: 0, kind: input, shape index: {}]   ;;  %s773_s1 = inlined_call_operand.vmem [shape: f32[8,8], index: 1, kind: input, shape index: {}]   ;;  %s774_s2 = inlined_call_operand.vmem [shape: f32[256,256], index: 2, kind: input, shape index: {}]   ;;  %s775_s3 = inlined_call_operand.vmem [shape: f32[64,256], index: 3, kind: output, shape index: {}]  }
   0x1 LB: > { %s494_s13 = sadd.s32 4294967295, %s527_s12   ;;  %p498_p0 = scmp.ge.s32.totalorder %s527_s12, 1  ;;  %s527_s12 = sphi %s549_s12, %s13_s12  }
   0x2   : > { %p139_p1 = scmp.lt.s32.totalorder %s527_s12, 5 }
   0x4   : > { %p140_p2 = pnand %p498_p0, %p139_p1 }
   0x5   : > { %s499_s14 = sshll.u32 (!%p140_p2), %s494_s13, 1 }
   0x6   : > { %143 = sbr.rel (%p140_p2) target bundleno = 286 (0x11e), region = 32  ;;  %p166_p3 = scmp.lt.s32.totalorder (!%p140_p2), %s499_s14, 7 }
   0xb   : > { %s777_s14 = smov (!%p166_p3, %s499_s14), 7  ;;  %v179_v0 = vld [vmem:[%s773_s1] sm:$0xff]  ;;  %vm182_vm0 = vcmask 64512   ;;  %v306_v5 = vld [vmem:[%s774_s2 + $0xf0] sm:$0xff]  ;;  %v307_v7 = vld [vmem:[%s774_s2 + $0xf8] sm:$0xff] }
   0xc   : > { %s511_s15 = sshll.u32 %s777_s14, 4  ;;  %v338_v6 = vld [vmem:[%s774_s2 + $0x1f0] sm:$0xff]  ;;  %v339_v8 = vld [vmem:[%s774_s2 + $0x1f8] sm:$0xff]  ;;  %v304_v9 = vld [vmem:[%s774_s2 + $0xe0] sm:$0xff] }
   0xd   : > { %s170_s18 = scalar_lea.vmem %s772_s0, %s511_s15  ;;  %v336_v10 = vld [vmem:[%s774_s2 + $0x1e0] sm:$0xff]  ;;  %v305_v11 = vld [vmem:[%s774_s2 + $0xe8] sm:$0xff]  ;;  %v302_v13 = vld [vmem:[%s774_s2 + $0xd0] sm:$0xff]  ;;  %s177_s4 = scalar_lea.vmem %s775_s3, %s511_s15 }
   0xe   : > { %v180_v1 = vld [vmem:[%s170_s18] sm:$0xff]  ;;  %v181_v2 = vld [vmem:[%s170_s18 + $0x8] sm:$0xff]  ;;  %v228_v3 = vld [vmem:[%s170_s18 + $0x10] sm:$0xff] }
   0xf   : > { %201 = vmatpush.msra.mxu0 %v180_v1  ;;  %221 = vmatpush.msra.mxu1 %v181_v2  ;;  %v229_v4 = vld [vmem:[%s170_s18 + $0x18] sm:$0xff]  ;;  %v337_v12 = vld [vmem:[%s774_s2 + $0x1e8] sm:$0xff]  ;;  %v334_v14 = vld [vmem:[%s774_s2 + $0x1d0] sm:$0xff] }
  0x10   : > { %505 = vmatmul.msk.f32.vlgmr.msra.gmra.mxu0 %vm182_vm0, %v179_v0  ;;  %506 = vmatmul.msk.f32.vlgmr.msra.gmra.mxu1 %vm182_vm0, %v179_v0  ;;  %v303_v15 = vld [vmem:[%s774_s2 + $0xd8] sm:$0xff]  ;;  %v300_v17 = vld [vmem:[%s774_s2 + $0xc0] sm:$0xff]  ;;  %v301_v19 = vld [vmem:[%s774_s2 + $0xc8] sm:$0xff] }
  0x11   : > { %245 = vmatpush.msra.mxu2 %v228_v3  ;;  %265 = vmatpush.msra.mxu3 %v229_v4  ;;  %v335_v16 = vld [vmem:[%s774_s2 + $0x1d8] sm:$0xff]  ;;  %v332_v18 = vld [vmem:[%s774_s2 + $0x1c0] sm:$0xff]  ;;  %v333_v20 = vld [vmem:[%s774_s2 + $0x1c8] sm:$0xff] }
  0x12   : > { %507 = vmatmul.msk.f32.vlgmr.msra.gmra.mxu2 %vm182_vm0, %v179_v0  ;;  %508 = vmatmul.msk.f32.vlgmr.msra.gmra.mxu3 %vm182_vm0, %v179_v0  ;;  %v298_v21 = vld [vmem:[%s774_s2 + $0xb0] sm:$0xff]  ;;  %v299_v23 = vld [vmem:[%s774_s2 + $0xb8] sm:$0xff]  ;;  %v296_v25 = vld [vmem:[%s774_s2 + $0xa0] sm:$0xff] }
  0x13   : > { %340 = vmatpush.msrb.mxu0 %v306_v5  ;;  %363 = vmatpush.msrb.mxu1 %v338_v6  ;;  %v330_v22 = vld [vmem:[%s774_s2 + $0x1b0] sm:$0xff]  ;;  %v331_v24 = vld [vmem:[%s774_s2 + $0x1b8] sm:$0xff]  ;;  %v328_v26 = vld [vmem:[%s774_s2 + $0x1a0] sm:$0xff] }
  0x14   : > { %386 = vmatpush.msrb.mxu2 %v307_v7  ;;  %409 = vmatpush.msrb.mxu3 %v339_v8  ;;  %v297_v27 = vld [vmem:[%s774_s2 + $0xa8] sm:$0xff]  ;;  %v294_v29 = vld [vmem:[%s774_s2 + $0x90] sm:$0xff]  ;;  %v295_v31 = vld [vmem:[%s774_s2 + $0x98] sm:$0xff] }
  0x15   : > { %341 = vmatpush.msrb.mxu0 %v304_v9  ;;  %364 = vmatpush.msrb.mxu1 %v336_v10  ;;  %v329_v28 = vld [vmem:[%s774_s2 + $0x1a8] sm:$0xff]  ;;  %v326_v30 = vld [vmem:[%s774_s2 + $0x190] sm:$0xff]  ;;  %v327_v32 = vld [vmem:[%s774_s2 + $0x198] sm:$0xff] }
  0x16   : > { %387 = vmatpush.msrb.mxu2 %v305_v11  ;;  %410 = vmatpush.msrb.mxu3 %v337_v12  ;;  %v292_v33 = vld [vmem:[%s774_s2 + $0x80] sm:$0xff]  ;;  %v293_v35 = vld [vmem:[%s774_s2 + $0x88] sm:$0xff]  ;;  %v290_v37 = vld [vmem:[%s774_s2 + $0x70] sm:$0xff] }
  0x17   : > { %342 = vmatpush.msrb.mxu0 %v302_v13  ;;  %365 = vmatpush.msrb.mxu1 %v334_v14  ;;  %v324_v34 = vld [vmem:[%s774_s2 + $0x180] sm:$0xff]  ;;  %v325_v36 = vld [vmem:[%s774_s2 + $0x188] sm:$0xff]  ;;  %v322_v38 = vld [vmem:[%s774_s2 + $0x170] sm:$0xff] }
  0x18   : > { %388 = vmatpush.msrb.mxu2 %v303_v15  ;;  %411 = vmatpush.msrb.mxu3 %v335_v16  ;;  %v291_v39 = vld [vmem:[%s774_s2 + $0x78] sm:$0xff]  ;;  %v288_v41 = vld [vmem:[%s774_s2 + $0x60] sm:$0xff]  ;;  %v289_v43 = vld [vmem:[%s774_s2 + $0x68] sm:$0xff] }
  0x19   : > { %343 = vmatpush.msrb.mxu0 %v300_v17  ;;  %366 = vmatpush.msrb.mxu1 %v332_v18  ;;  %v323_v40 = vld [vmem:[%s774_s2 + $0x178] sm:$0xff]  ;;  %v320_v42 = vld [vmem:[%s774_s2 + $0x160] sm:$0xff]  ;;  %v321_v44 = vld [vmem:[%s774_s2 + $0x168] sm:$0xff] }
  0x1a   : > { %389 = vmatpush.msrb.mxu2 %v301_v19  ;;  %412 = vmatpush.msrb.mxu3 %v333_v20  ;;  %v286_v45 = vld [vmem:[%s774_s2 + $0x50] sm:$0xff]  ;;  %v287_v47 = vld [vmem:[%s774_s2 + $0x58] sm:$0xff]  ;;  %v284_v49 = vld [vmem:[%s774_s2 + $0x40] sm:$0xff] }
  0x1b   : > { %344 = vmatpush.msrb.mxu0 %v298_v21  ;;  %367 = vmatpush.msrb.mxu1 %v330_v22  ;;  %v318_v46 = vld [vmem:[%s774_s2 + $0x150] sm:$0xff]  ;;  %v319_v48 = vld [vmem:[%s774_s2 + $0x158] sm:$0xff]  ;;  %v316_v50 = vld [vmem:[%s774_s2 + $0x140] sm:$0xff] }
  0x1c   : > { %390 = vmatpush.msrb.mxu2 %v299_v23  ;;  %413 = vmatpush.msrb.mxu3 %v331_v24  ;;  %v285_v51 = vld [vmem:[%s774_s2 + $0x48] sm:$0xff]  ;;  %v282_v53 = vld [vmem:[%s774_s2 + $0x30] sm:$0xff]  ;;  %v283_v55 = vld [vmem:[%s774_s2 + $0x38] sm:$0xff] }
  0x1d   : > { %345 = vmatpush.msrb.mxu0 %v296_v25  ;;  %368 = vmatpush.msrb.mxu1 %v328_v26  ;;  %v317_v52 = vld [vmem:[%s774_s2 + $0x148] sm:$0xff]  ;;  %v314_v54 = vld [vmem:[%s774_s2 + $0x130] sm:$0xff]  ;;  %v315_v56 = vld [vmem:[%s774_s2 + $0x138] sm:$0xff] }
  0x1e   : > { %391 = vmatpush.msrb.mxu2 %v297_v27  ;;  %414 = vmatpush.msrb.mxu3 %v329_v28  ;;  %v280_v57 = vld [vmem:[%s774_s2 + $0x20] sm:$0xff]  ;;  %v281_v59 = vld [vmem:[%s774_s2 + $0x28] sm:$0xff]  ;;  %v278_v61 = vld [vmem:[%s774_s2 + $0x10] sm:$0xff] }
  0x1f   : > { %346 = vmatpush.msrb.mxu0 %v294_v29  ;;  %369 = vmatpush.msrb.mxu1 %v326_v30  ;;  %v312_v58 = vld [vmem:[%s774_s2 + $0x120] sm:$0xff]  ;;  %v313_v60 = vld [vmem:[%s774_s2 + $0x128] sm:$0xff]  ;;  %v310_v62 = vld [vmem:[%s774_s2 + $0x110] sm:$0xff] }
  0x20   : > { %392 = vmatpush.msrb.mxu2 %v295_v31  ;;  %415 = vmatpush.msrb.mxu3 %v327_v32  ;;  %v279_v63 = vld [vmem:[%s774_s2 + $0x18] sm:$0xff]  ;;  %v276_v1 = vld [vmem:[%s774_s2] sm:$0xff]  ;;  %v277_v3 = vld [vmem:[%s774_s2 + $0x8] sm:$0xff] }
  0x21   : > { %347 = vmatpush.msrb.mxu0 %v292_v33  ;;  %370 = vmatpush.msrb.mxu1 %v324_v34  ;;  %v311_v0 = vld [vmem:[%s774_s2 + $0x118] sm:$0xff]  ;;  %v308_v2 = vld [vmem:[%s774_s2 + $0x100] sm:$0xff]  ;;  %v309_v4 = vld [vmem:[%s774_s2 + $0x108] sm:$0xff] }
  0x22   : > { %393 = vmatpush.msrb.mxu2 %v293_v35  ;;  %416 = vmatpush.msrb.mxu3 %v325_v36 }
  0x23   : > { %348 = vmatpush.msrb.mxu0 %v290_v37  ;;  %371 = vmatpush.msrb.mxu1 %v322_v38 }
  0x24   : > { %394 = vmatpush.msrb.mxu2 %v291_v39  ;;  %417 = vmatpush.msrb.mxu3 %v323_v40 }
  0x25   : > { %349 = vmatpush.msrb.mxu0 %v288_v41  ;;  %372 = vmatpush.msrb.mxu1 %v320_v42 }
  0x26   : > { %395 = vmatpush.msrb.mxu2 %v289_v43  ;;  %418 = vmatpush.msrb.mxu3 %v321_v44 }
  0x27   : > { %350 = vmatpush.msrb.mxu0 %v286_v45  ;;  %373 = vmatpush.msrb.mxu1 %v318_v46 }
  0x28   : > { %396 = vmatpush.msrb.mxu2 %v287_v47  ;;  %419 = vmatpush.msrb.mxu3 %v319_v48 }
  0x29   : > { %351 = vmatpush.msrb.mxu0 %v284_v49  ;;  %374 = vmatpush.msrb.mxu1 %v316_v50 }
  0x2a   : > { %397 = vmatpush.msrb.mxu2 %v285_v51  ;;  %420 = vmatpush.msrb.mxu3 %v317_v52 }
  0x2b   : > { %352 = vmatpush.msrb.mxu0 %v282_v53  ;;  %375 = vmatpush.msrb.mxu1 %v314_v54 }
  0x2c   : > { %398 = vmatpush.msrb.mxu2 %v283_v55  ;;  %421 = vmatpush.msrb.mxu3 %v315_v56 }
  0x2d   : > { %353 = vmatpush.msrb.mxu0 %v280_v57  ;;  %376 = vmatpush.msrb.mxu1 %v312_v58 }
  0x2e   : > { %399 = vmatpush.msrb.mxu2 %v281_v59  ;;  %422 = vmatpush.msrb.mxu3 %v313_v60 }
  0x2f   : > { %354 = vmatpush.msrb.mxu0 %v278_v61  ;;  %377 = vmatpush.msrb.mxu1 %v310_v62 }
  0x30   : > { %400 = vmatpush.msrb.mxu2 %v279_v63  ;;  %423 = vmatpush.msrb.mxu3 %v311_v0 }
  0x31   : > { %355 = vmatpush.msrb.mxu0 %v276_v1  ;;  %378 = vmatpush.msrb.mxu1 %v308_v2 }
  0x32   : > { %401 = vmatpush.msrb.mxu2 %v277_v3  ;;  %424 = vmatpush.msrb.mxu3 %v309_v4 }
  0x8d   : > { %v203_v5 = vpop.f32.mrf.mxu0  ;;  %v223_v6 = vpop.f32.mrf.mxu1 }
  0x8e   : > { %356 = vmatmul.f32.vlgmr.msrb.gmra.mxu0 %v203_v5  ;;  %379 = vmatmul.f32.vlgmr.msrb.gmra.mxu1 %v223_v6 }
  0x8f   : > { %402 = vmatmul.f32.vlgmr.msrb.gmra.mxu2 %v203_v5  ;;  %425 = vmatmul.f32.vlgmr.msrb.gmra.mxu3 %v223_v6 }
  0x95   : > { %v247_v7 = vpop.f32.mrf.mxu2  ;;  %v267_v8 = vpop.f32.mrf.mxu3 }
  0x96   : > { %359 = vmatmul.f32.gmra.mxu0 %v247_v7  ;;  %382 = vmatmul.f32.gmra.mxu1 %v267_v8 }
  0x97   : > { %405 = vmatmul.f32.gmra.mxu2 %v247_v7  ;;  %428 = vmatmul.f32.gmra.mxu3 %v267_v8 }
 0x10b   : > { %v357_v9 = vpop.f32.mrf.mxu0  ;;  %v380_v10 = vpop.f32.mrf.mxu1 }
 0x10c   : > { %v381_v11 = vadd.f32 %v380_v10, %v357_v9 }
 0x10e   : > { %432 = vst [vmem:[%s177_s4] sm:$0xff] %v381_v11 }
 0x112   : > { %v403_v12 = vpop.f32.mrf.mxu2  ;;  %v426_v13 = vpop.f32.mrf.mxu3 }
 0x113   : > { %v427_v14 = vadd.f32 %v426_v13, %v403_v12  ;;  %v360_v15 = vpop.f32.mrf.mxu0  ;;  %v383_v16 = vpop.f32.mrf.mxu1 }
 0x114   : > { %v384_v17 = vadd.f32 %v383_v16, %v360_v15 }
 0x115   : > { %433 = vst [vmem:[%s177_s4 + $0x8] sm:$0xff] %v427_v14 }
 0x116   : > { %434 = vst [vmem:[%s177_s4 + $0x10] sm:$0xff] %v384_v17 }
 0x11a   : > { %v406_v18 = vpop.f32.mrf.mxu2  ;;  %v429_v19 = vpop.f32.mrf.mxu3 }
 0x11b   : > { %v430_v20 = vadd.f32 %v429_v19, %v406_v18 }
 0x11d   : > { %435 = vst [vmem:[%s177_s4 + $0x18] sm:$0xff] %v430_v20 }
 0x11e PF: > { %s13_s12 = sadd.s32 1, %s527_s12  }
 0x11f   : > { %p10_p4 = scmp.ge.s32.totalorder %s13_s12, 6  }
 0x121   :  { %12 = sbr.rel (!%p10_p4) target bundleno = 1 (0x1), region = 62 }

</bundles_post_ra>
